<compile_context>
chip_gen: v6e
topology: v6e:2x2x1
jax: 0.10.0
libtpu: 0.0.40
codegen_flags: <defaults>
</compile_context>

<pallas_src>
import jax
import jax.numpy as jnp
from jax.experimental import pallas as pl
from jax.experimental.pallas import tpu as pltpu


def _round_up(x, m):
    return (x + m - 1) // m * m


def _pack_params(weights, biases, param_dtype, lane):
    """Pack weights into one (rows, lane) slab and biases into an f32 (n_layers, lane) slab.

    Layer 0's weight block has round_up(in_0, 8) rows (matches the narrow streamed x);
    every later block is a full (lane, lane) zero-padded tile so all in-kernel weight
    loads are full-width rows x 128-lane-dense columns.
    """
    n_layers = len(weights)
    k0 = _round_up(int(weights[0].shape[0]), 8)
    row_offs = [0]
    rows = k0
    for _ in range(1, n_layers):
        row_offs.append(rows)
        rows += lane

    w_slab = jnp.zeros((rows, lane), param_dtype)
    b_slab = jnp.zeros((n_layers, lane), jnp.float32)
    for i, (w, b) in enumerate(zip(weights, biases)):
        din, dout = int(w.shape[0]), int(w.shape[1])
        w_slab = w_slab.at[row_offs[i]:row_offs[i] + din, :dout].set(
            w.astype(param_dtype))
        b_slab = b_slab.at[i, :dout].set(b.astype(jnp.float32))
    return w_slab, b_slab, tuple(row_offs), k0


def _make_kernel(n_layers, row_offs, k0, lane, tb, true_batch, needs_mask,
                 mxu_dtype, dot_precision):
    """Kernel closure for a fixed (static) layer structure."""

    def kernel(x_ref, y_ref, w_ref, b_ref, o_ref):
        # Layer 0: (tb, K0) @ (K0, lane); x streamed narrow, upcast/cast for the MXU.
        h = jnp.dot(x_ref[...].astype(mxu_dtype), w_ref[0:k0, :],
                    preferred_element_type=jnp.float32,
                    precision=dot_precision)
        h = h + b_ref[0:1, :]                       # bias add in f32
        for i in range(1, n_layers):
            h = h * jax.lax.logistic(h)             # SiLU in f32 (EUP)
            w = w_ref[row_offs[i]:row_offs[i] + lane, :]   # full (lane, lane) tile
            h = jnp.dot(h.astype(mxu_dtype), w,
                        preferred_element_type=jnp.float32,
                        precision=dot_precision)
            h = h + b_ref[i:i + 1, :]

        # y is lane-padded to `lane` in the wrapper; padded h lanes are exactly 0,
        # so the full-width diff is correct with no masked lane ops.
        diff = h - y_ref[...].astype(jnp.float32)
        sq = diff * diff
        if needs_mask:
            row = (pl.program_id(0) * tb
                   + jax.lax.broadcasted_iota(jnp.int32, sq.shape, 0))
            sq = jnp.where(row < true_batch, sq, 0.0)

        # Lane-dense per-tile partial SSE; cross-lane reduce happens in the wrapper.
        o_ref[...] = jnp.sum(sq, axis=0, keepdims=True)

    return kernel


def sinmlp_loss(x, y, weights, biases, *, param_dtype=jnp.bfloat16,
                dot_precision=None, batch_tile=None, max_batch_tile=2048):
    """Forward pass of SinMLP: MLP(x) vs y -> scalar MSE loss (mean reduction).

    weights[i]: (in_i, out_i)  (transposed vs PyTorch's (out, in))
    biases[i]:  (out_i,)
    param_dtype controls the MXU operand dtype (weights + activation casts); biases
    and all elementwise math stay f32.  Set dot_precision (e.g.
    jax.lax.Precision.HIGHEST) if exact f32 accumulation of f32 weights is required.
    """
    n_layers = len(weights)
    assert n_layers >= 2, "At least an input linear and an output linear are needed"
    batch, input_size = x.shape
    output_size = int(weights[-1].shape[1])
    assert y.shape == (batch, output_size)

    dims_out = [int(w.shape[1]) for w in weights]
    lane = _round_up(max(dims_out), 128)

    w_slab, b_slab, row_offs, k0 = _pack_params(weights, biases, param_dtype, lane)

    # Batch tile: large (amortizes ~0.35us/step), multiple of 8; pad batch up to a
    # multiple of the tile and mask the padded rows in-kernel.
    if batch_tile is not None:
        tb = _round_up(int(batch_tile), 8)
    else:
        tb = min(_round_up(batch, 8), max_batch_tile)
    padded_batch = _round_up(batch, tb)
    grid = (padded_batch // tb,)
    needs_mask = padded_batch != batch

    # Stream x/y in their stored dtype (upcast in-kernel). Lane-pad so every
    # in-kernel op is full-width.
    x_p = jnp.pad(x, ((0, padded_batch - batch), (0, k0 - input_size)))
    y_p = jnp.pad(y, ((0, padded_batch - batch), (0, lane - output_size)))

    kernel = _make_kernel(n_layers, row_offs, k0, lane, tb, batch, needs_mask,
                          param_dtype, dot_precision)

    flops = int(2 * padded_batch * (k0 * lane + (n_layers - 1) * lane * lane))
    transcendentals = int(padded_batch * lane * (n_layers - 1))
    bytes_accessed = int(x_p.size * x_p.dtype.itemsize
                         + y_p.size * y_p.dtype.itemsize
                         + w_slab.size * w_slab.dtype.itemsize
                         + b_slab.size * 4
                         + grid[0] * lane * 4)

    # Explicit scoped-VMEM budget: double-buffered x/y/out tiles + (double-buffered)
    # param slabs + headroom for a few f32 activation temporaries.
    x_tile_b = tb * k0 * x_p.dtype.itemsize
    y_tile_b = tb * lane * y_p.dtype.itemsize
    w_b = w_slab.size * w_slab.dtype.itemsize
    b_b = b_slab.size * 4
    interm_b = 6 * tb * lane * 4
    vmem_limit = int(min(max(2 * (x_tile_b + y_tile_b + lane * 4)
                             + 2 * (w_b + b_b) + interm_b + (2 << 20),
                             16 << 20),
                         64 << 20))

    partials = pl.pallas_call(
        kernel,
        out_shape=jax.ShapeDtypeStruct((grid[0], lane), jnp.float32),
        grid=grid,
        in_specs=[
            pl.BlockSpec((tb, k0), lambda i: (i, 0)),        # x: batch-tiled, narrow K0
            pl.BlockSpec((tb, lane), lambda i: (i, 0)),      # y: batch-tiled, lane-padded
            pl.BlockSpec(w_slab.shape, lambda i: (0, 0)),    # weights: whole-array resident
            pl.BlockSpec(b_slab.shape, lambda i: (0, 0)),    # f32 biases: resident
        ],
        out_specs=pl.BlockSpec((1, lane), lambda i: (i, 0)), # lane-dense per-tile partial
        compiler_params=pltpu.CompilerParams(
            dimension_semantics=("parallel",),               # no cross-step state
            vmem_limit_bytes=vmem_limit),
        cost_estimate=pl.CostEstimate(
            flops=flops, transcendentals=transcendentals,
            bytes_accessed=bytes_accessed),
    )(x_p, y_p, w_slab, b_slab)

    inv_n = 1.0 / float(batch * output_size)                 # MSE 'mean' reduction
    return jnp.sum(partials) * inv_n


def init_sinmlp_params(key, input_size, hidden_size, output_size, n_layers):
    """PyTorch-Linear-style uniform(-1/sqrt(fan_in), 1/sqrt(fan_in)) init."""
    dims = [input_size] + [hidden_size] * (n_layers - 1) + [output_size]
    weights, biases = [], []
    for i in range(n_layers):
        fan_in, fan_out = dims[i], dims[i + 1]
        key, kw, kb = jax.random.split(key, 3)
        bound = 1.0 / (fan_in ** 0.5)
        w = jax.random.uniform(kw, (fan_in, fan_out), jnp.float32, -bound, bound)
        b = jax.random.uniform(kb, (fan_out,), jnp.float32, -bound, bound)
        weights.append(w)
        biases.append(b)
    return weights, biases


def sinmlp_loss_ref(x, y, weights, biases):
    """Pure-JAX reference for correctness checking."""
    h = x.astype(jnp.float32)
    n_layers = len(weights)
    for i, (w, b) in enumerate(zip(weights, biases)):
        h = h @ w + b
        if i < n_layers - 1:
            h = jax.nn.silu(h)
    diff = h - y.astype(jnp.float32)
    return jnp.mean(diff * diff)


if __name__ == "__main__":
    # Small shapes consistent with the module: batch=8, input=16, hidden=32,
    # output=16, n_layers=3.
    batch, input_size, hidden_size, output_size, n_layers = 8, 16, 32, 16, 3

    key = jax.random.PRNGKey(0)
    key, kx, ky, kp = jax.random.split(key, 4)
    x = jax.random.normal(kx, (batch, input_size), jnp.float32)
    y = jax.random.normal(ky, (batch, output_size), jnp.float32)
    weights, biases = init_sinmlp_params(kp, input_size, hidden_size,
                                         output_size, n_layers)

    loss_ref = jax.block_until_ready(sinmlp_loss_ref(x, y, weights, biases))

    # f32 weight slab: same dtype path as the pure-JAX reference.
    loss_f32 = jax.block_until_ready(
        sinmlp_loss(x, y, weights, biases, param_dtype=jnp.float32))
    assert jnp.allclose(loss_f32, loss_ref, rtol=1e-5, atol=1e-5), (loss_f32, loss_ref)

    # Default bf16 weight slab (MXU-native); biases stay f32.
    loss_bf16 = jax.block_until_ready(sinmlp_loss(x, y, weights, biases))
    assert jnp.allclose(loss_bf16, loss_ref, rtol=2e-2, atol=2e-2), (loss_bf16, loss_ref)

    # Ragged batch path: batch=12, tile=8 -> padded to 16 rows, in-kernel row mask.
    key, kx2, ky2 = jax.random.split(key, 3)
    xb = jax.random.normal(kx2, (12, input_size), jnp.float32)
    yb = jax.random.normal(ky2, (12, output_size), jnp.float32)
    loss_ragged = jax.block_until_ready(
        sinmlp_loss(xb, yb, weights, biases, param_dtype=jnp.float32, batch_tile=8))
    loss_ragged_ref = jax.block_until_ready(sinmlp_loss_ref(xb, yb, weights, biases))
    assert jnp.allclose(loss_ragged, loss_ragged_ref, rtol=1e-5, atol=1e-5), (
        loss_ragged, loss_ragged_ref)

    print("KERNEL_OK")
</pallas_src>

<mosaic_0001>
module attributes {stable_mosaic.version = 11 : i64} {
  func.func @kernel(%arg0: i32, %arg1: memref<8x16xf32, #tpu.memory_space<vmem>>, %arg2: memref<8x128xf32, #tpu.memory_space<vmem>>, %arg3: memref<272x128xf32, #tpu.memory_space<vmem>>, %arg4: memref<3x128xf32, #tpu.memory_space<vmem>>, %arg5: memref<1x128xf32, #tpu.memory_space<vmem>>) attributes {dimension_semantics = [#tpu.dimension_semantics<parallel>], iteration_bounds = array<i64: 1>, scalar_prefetch = 0 : i64, scratch_operands = 0 : i64, tpu.core_type = #tpu.core_type<tc>, window_params = [{transform_indices = @transform_0, window_bounds = array<i64: 8, 16>}, {transform_indices = @transform_1, window_bounds = array<i64: 8, 128>}, {pipeline_mode = #tpu.pipeline_mode<synchronous>, transform_indices = @transform_2, window_bounds = array<i64: 272, 128>}, {pipeline_mode = #tpu.pipeline_mode<synchronous>, transform_indices = @transform_3, window_bounds = array<i64: 3, 128>}, {transform_indices = @transform_4, window_bounds = array<i64: 1, 128>}]} {
    %c0 = arith.constant 0 : index
    %c0_0 = arith.constant 0 : index
    %0 = vector.load %arg1[%c0, %c0_0] : memref<8x16xf32, #tpu.memory_space<vmem>>, vector<8x16xf32>
    %c0_1 = arith.constant 0 : index
    %c0_2 = arith.constant 0 : index
    %1 = vector.load %arg3[%c0_1, %c0_2] : memref<272x128xf32, #tpu.memory_space<vmem>>, vector<16x128xf32>
    %cst = arith.constant dense<0.000000e+00> : vector<8x128xf32>
    %2 = tpu.matmul %0, %1, %cst {dimension_numbers = #tpu.dot_dimension_numbers<[1], [0], [0], [1], [0, 0, 1, 1], [], []>} : vector<8x16xf32>, vector<16x128xf32>, vector<8x128xf32> -> vector<8x128xf32>
    %c0_3 = arith.constant 0 : index
    %c0_4 = arith.constant 0 : index
    %3 = vector.load %arg4[%c0_3, %c0_4] : memref<3x128xf32, #tpu.memory_space<vmem>>, vector<1x128xf32>
    %4 = vector.broadcast %3 : vector<1x128xf32> to vector<8x128xf32>
    %5 = arith.addf %2, %4 : vector<8x128xf32>
    %6 = arith.negf %5 : vector<8x128xf32>
    %7 = math.exp %6 : vector<8x128xf32>
    %cst_5 = arith.constant 1.000000e+00 : f32
    %8 = vector.broadcast %cst_5 : f32 to vector<8x128xf32>
    %9 = arith.addf %8, %7 : vector<8x128xf32>
    %10 = arith.divf %8, %9 : vector<8x128xf32>
    %11 = arith.mulf %5, %10 : vector<8x128xf32>
    %c16 = arith.constant 16 : index
    %c0_6 = arith.constant 0 : index
    %12 = vector.load %arg3[%c16, %c0_6] : memref<272x128xf32, #tpu.memory_space<vmem>>, vector<128x128xf32>
    %cst_7 = arith.constant dense<0.000000e+00> : vector<8x128xf32>
    %13 = tpu.matmul %11, %12, %cst_7 {dimension_numbers = #tpu.dot_dimension_numbers<[1], [0], [0], [1], [0, 0, 1, 1], [], []>} : vector<8x128xf32>, vector<128x128xf32>, vector<8x128xf32> -> vector<8x128xf32>
    %c1 = arith.constant 1 : index
    %c0_8 = arith.constant 0 : index
    %14 = vector.load %arg4[%c1, %c0_8] : memref<3x128xf32, #tpu.memory_space<vmem>>, vector<1x128xf32>
    %15 = vector.broadcast %14 : vector<1x128xf32> to vector<8x128xf32>
    %16 = arith.addf %13, %15 : vector<8x128xf32>
    %17 = arith.negf %16 : vector<8x128xf32>
    %18 = math.exp %17 : vector<8x128xf32>
    %cst_9 = arith.constant 1.000000e+00 : f32
    %19 = vector.broadcast %cst_9 : f32 to vector<8x128xf32>
    %20 = arith.addf %19, %18 : vector<8x128xf32>
    %21 = arith.divf %19, %20 : vector<8x128xf32>
    %22 = arith.mulf %16, %21 : vector<8x128xf32>
    %c144 = arith.constant 144 : index
    %c0_10 = arith.constant 0 : index
    %23 = vector.load %arg3[%c144, %c0_10] : memref<272x128xf32, #tpu.memory_space<vmem>>, vector<128x128xf32>
    %cst_11 = arith.constant dense<0.000000e+00> : vector<8x128xf32>
    %24 = tpu.matmul %22, %23, %cst_11 {dimension_numbers = #tpu.dot_dimension_numbers<[1], [0], [0], [1], [0, 0, 1, 1], [], []>} : vector<8x128xf32>, vector<128x128xf32>, vector<8x128xf32> -> vector<8x128xf32>
    %c2 = arith.constant 2 : index
    %c0_12 = arith.constant 0 : index
    %25 = vector.load %arg4[%c2, %c0_12] : memref<3x128xf32, #tpu.memory_space<vmem>>, vector<1x128xf32>
    %26 = vector.broadcast %25 : vector<1x128xf32> to vector<8x128xf32>
    %27 = arith.addf %24, %26 : vector<8x128xf32>
    %c0_13 = arith.constant 0 : index
    %c0_14 = arith.constant 0 : index
    %28 = vector.load %arg2[%c0_13, %c0_14] : memref<8x128xf32, #tpu.memory_space<vmem>>, vector<8x128xf32>
    %29 = arith.subf %27, %28 : vector<8x128xf32>
    %30 = arith.mulf %29, %29 : vector<8x128xf32>
    %cst_15 = arith.constant dense<0.000000e+00> : vector<128xf32>
    %31 = vector.multi_reduction <add>, %30, %cst_15 [0] : vector<8x128xf32> to vector<128xf32>
    %32 = vector.shape_cast %31 : vector<128xf32> to vector<1x128xf32>
    %c0_16 = arith.constant 0 : index
    %c0_17 = arith.constant 0 : index
    %33 = vector.load %arg5[%c0_16, %c0_17] : memref<1x128xf32, #tpu.memory_space<vmem>>, vector<1x128xf32>
    tpu.vector_store %arg5[%c0_16, %c0_17], %32 {strides = array<i32>} : memref<1x128xf32, #tpu.memory_space<vmem>>, vector<1x128xf32>,
    return
  }
  func.func @transform_0(%arg0: i32) -> (i32, i32) {
    %c0_i32 = arith.constant 0 : i32
    %c0_i32_0 = arith.constant 0 : i32
    return %arg0, %c0_i32 : i32, i32
  }
  func.func @transform_1(%arg0: i32) -> (i32, i32) {
    %c0_i32 = arith.constant 0 : i32
    %c0_i32_0 = arith.constant 0 : i32
    return %arg0, %c0_i32 : i32, i32
  }
  func.func @transform_2(%arg0: i32) -> (i32, i32) {
    %c0_i32 = arith.constant 0 : i32
    %c0_i32_0 = arith.constant 0 : i32
    %c0_i32_1 = arith.constant 0 : i32
    return %c0_i32, %c0_i32_0 : i32, i32
  }
  func.func @transform_3(%arg0: i32) -> (i32, i32) {
    %c0_i32 = arith.constant 0 : i32
    %c0_i32_0 = arith.constant 0 : i32
    %c0_i32_1 = arith.constant 0 : i32
    return %c0_i32, %c0_i32_0 : i32, i32
  }
  func.func @transform_4(%arg0: i32) -> (i32, i32) {
    %c0_i32 = arith.constant 0 : i32
    %c0_i32_0 = arith.constant 0 : i32
    return %arg0, %c0_i32 : i32, i32
  }
}

</mosaic_0001>

<bundles_post_ra>
// kernel: tpu_custom_call.1
= control target key start
LH: loop header
LB: loop body
LE: loop exit
PB: predicated region body
PF: predicated region fallthrough
CT: control target
= control target key end

     0   :  { %9 = vsyncpa [#allocation3], 0  ;;  %s672_s0 = inlined_call_operand.hbm [shape: f32[8,16], index: 0, kind: input, shape index: {}]   ;;  %s673_s1 = inlined_call_operand.hbm [shape: f32[8,128], index: 1, kind: input, shape index: {}]   ;;  %s674_s2 = inlined_call_operand.hbm [shape: f32[272,128], index: 2, kind: input, shape index: {}]   ;;  %s675_s3 = inlined_call_operand.vmem [shape: f32[3,128], index: 3, kind: input, shape index: {}]   ;;  %s676_s4 = inlined_call_operand.hbm [shape: f32[1,128], index: 4, kind: output, shape index: {}]  }
   0x1   :  { %10 = vsyncpa [#allocation6], 0 }
   0x2   :  { %11 = vsyncpa [#allocation4], 0  ;;  %s581_s15 = smov [#allocation5]   ;;  %s582_s17 = smov [#allocation2]  }
   0x3   :  { %s28_s16 = sshll.u32 %s581_s15, 4  ;;  %s18_s18 = sshll.u32 %s582_s17, 4  ;;  %s29_s16 = int_to_ptr.vmem [resolvable:$true] %s28_s16  ;;  %s19_s18 = int_to_ptr.vmem [resolvable:$true] %s18_s18 }
   0x4   :  { %s503_s19 = scalar_lea.vmem %s29_s16, 128  ;;  %p508_p1 = scmp.lt.s32.totalorder %s29_s16, %s29_s16 }
   0x5   :  { %p504_p0 = scmp.ne.s32.totalorder %s29_s16, %s503_s19  ;;  %p509_p2 = scmp.lt.s32.totalorder %s503_s19, %s503_s19 }
   0x7   :  { %p510_p3 = por %p509_p2, %p508_p1 }
   0x9   :  { %p511_p4 = pnand %p510_p3, %p504_p0 }
   0xb   :  { %514 = shalt.err (!%p511_p4)
}
   0xc   :  { %31 = dma.hbm_to_vmem [thread:$0]  %s673_s1, 128, %s29_s16, [#allocation6]  }
   0xd   :  { %s523_s22 = scalar_lea.vmem %s19_s18, 128  ;;  %p528_p6 = scmp.lt.s32.totalorder %s19_s18, %s19_s18 }
   0xe   :  { %p524_p5 = scmp.ne.s32.totalorder %s19_s18, %s523_s22  ;;  %p529_p7 = scmp.lt.s32.totalorder %s523_s22, %s523_s22 }
  0x10   :  { %p530_p8 = por %p529_p7, %p528_p6 }
  0x12   :  { %p531_p9 = pnand %p530_p8, %p524_p5 }
  0x14   :  { %534 = shalt.err (!%p531_p9)
}
  0x15   :  { %21 = dma.hbm_to_vmem [thread:$0]  %s672_s0, 128, %s19_s18, [#allocation3]  }
  0x16   :  { %s583_s25 = smov [#allocation7]  }
  0x17   :  { %s37_s26 = sshll.u32 %s583_s25, 4  ;;  %s38_s26 = int_to_ptr.vmem [resolvable:$true] %s37_s26 }
  0x18   :  { %s543_s27 = scalar_lea.vmem %s38_s26, 4352  ;;  %p548_p11 = scmp.lt.s32.totalorder %s38_s26, %s38_s26 }
  0x19   :  { %p544_p10 = scmp.ne.s32.totalorder %s38_s26, %s543_s27  ;;  %p549_p12 = scmp.lt.s32.totalorder %s543_s27, %s543_s27 }
  0x1b   :  { %p550_p13 = por %p549_p12, %p548_p11 }
  0x1d   :  { %p551_p0 = pnand %p550_p13, %p544_p10 }
  0x1f   :  { %554 = shalt.err (!%p551_p0)
}
  0x20   :  { %s584_s1 = smov 128   ;;  %s585_s28 = smov 8  }
  0x21   :  { %43 = dma.hbm_to_vmem [thread:$0]  %s674_s2, 4352, %s38_s26, [#allocation6], %s584_s1, %s584_s1, %s585_s28  }
  0x22   :  { %575 = dma.done.wait [#allocation3], 128  }
  0x23   :  { %576 = vsyncadd [#allocation3], 4294967168 }
  0x24   :  { %577 = dma.done.wait [#allocation6], 4480  }
  0x25   :  { %578 = vsyncadd [#allocation6], 4294962816  ;;  %v586_v0 = vmov 0.0   ;;  %vm587_vm0 = vmmov 0   ;;  %v57_v1 = vld [vmem:[#allocation7 + $0x8] sm:$0xff]  ;;  %v56_v2 = vld [vmem:[#allocation7] sm:$0xff] }
  0x26   :  { %402 = vmatprep.subr.mxu0 %v586_v0  ;;  %406 = vmatprep.mubr.msk.f32.mxu0 %vm587_vm0, %v586_v0  ;;  %v55_v3 = vld [vmem:[#allocation2] sm:$0xff]  ;;  %vm63_vm1 = vcmask 130048   ;;  %v159_v4 = vld [vmem:[#allocation7 + $0x88] sm:$0xff]  ;;  %v158_v5 = vld [vmem:[#allocation7 + $0x80] sm:$0xff]  ;;  %s588_s9 = smov [#allocation8]  }
  0x27   :  { %409 = vmatprep.subr.mxu1 %v586_v0  ;;  %441 = vmatprep.mubr.msk.f32.mxu1 %vm587_vm0, %v586_v0  ;;  %v157_v6 = vld [vmem:[#allocation7 + $0x78] sm:$0xff]  ;;  %v156_v7 = vld [vmem:[#allocation7 + $0x70] sm:$0xff]  ;;  %v155_v8 = vld [vmem:[#allocation7 + $0x68] sm:$0xff]  ;;  %s349_s10 = sshll.u32 %s588_s9, 4  ;;  %s350_s10 = int_to_ptr.vmem [resolvable:$true] %s349_s10 }
  0x28   :  { %403 = vmatpush3.msra.mxu0 %v57_v1  ;;  %410 = vmatpush3.msra.mxu1 %v159_v4  ;;  %v154_v9 = vld [vmem:[#allocation7 + $0x60] sm:$0xff]  ;;  %v153_v10 = vld [vmem:[#allocation7 + $0x58] sm:$0xff]  ;;  %v152_v11 = vld [vmem:[#allocation7 + $0x50] sm:$0xff]  ;;  %s555_s11 = scalar_lea.vmem %s350_s10, 16  ;;  %s559_s12 = scalar_lea.vmem %s350_s10, 32 }
  0x29   :  { %404 = vmatprep.subr.mxu0 %v586_v0  ;;  %411 = vmatprep.subr.mxu1 %v586_v0  ;;  %v151_v12 = vld [vmem:[#allocation7 + $0x48] sm:$0xff]  ;;  %v150_v13 = vld [vmem:[#allocation7 + $0x40] sm:$0xff]  ;;  %v149_v14 = vld [vmem:[#allocation7 + $0x38] sm:$0xff]  ;;  %p556_p1 = scmp.ne.s32.totalorder %s350_s10, %s555_s11  ;;  %p560_p2 = scmp.lt.s32.totalorder %s350_s10, %s350_s10 }
  0x2a   :  { %405 = vmatpush3.msra.mxu0 %v56_v2  ;;  %412 = vmatpush3.msra.mxu1 %v158_v5  ;;  %v148_v15 = vld [vmem:[#allocation7 + $0x30] sm:$0xff]  ;;  %v147_v16 = vld [vmem:[#allocation7 + $0x28] sm:$0xff]  ;;  %v146_v17 = vld [vmem:[#allocation7 + $0x20] sm:$0xff]  ;;  %p561_p3 = scmp.lt.s32.totalorder %s559_s12, %s555_s11 }
  0x2b   :  { %407 = vmatmul.mubr.msk.f32.vlgmr.msra.gmra.mxu0 %vm63_vm1, %v55_v3  ;;  %444 = vmatprep.subr.mxu0 %v586_v0  ;;  %v145_v18 = vld [vmem:[#allocation7 + $0x18] sm:$0xff]  ;;  %v144_v19 = vld [vmem:[#allocation7 + $0x10] sm:$0xff]  ;;  %v257_v29 = vld [vmem:[#allocation7 + $0x108] sm:$0xff] }
  0x2c   :  { %476 = vmatprep.mubr.msk.f32.mxu0 %vm587_vm0, %v586_v0  ;;  %413 = vmatprep.subr.mxu1 %v586_v0  ;;  %v359_v20 = vld [vmem:[%s675_s3] ss:$0 sm:$0xff]  ;;  %v256_v30 = vld [vmem:[#allocation7 + $0x100] sm:$0xff]  ;;  %v255_v31 = vld [vmem:[#allocation7 + $0xf8] sm:$0xff]  ;;  %p562_p4 = por %p561_p3, %p560_p2 }
  0x2d   :  { %414 = vmatpush3.msra.mxu1 %v157_v6  ;;  %445 = vmatpush3.msra.mxu0 %v257_v29  ;;  %v254_v32 = vld [vmem:[#allocation7 + $0xf0] sm:$0xff]  ;;  %v253_v33 = vld [vmem:[#allocation7 + $0xe8] sm:$0xff]  ;;  %v252_v34 = vld [vmem:[#allocation7 + $0xe0] sm:$0xff] }
  0x2e   :  { %415 = vmatprep.subr.mxu1 %v586_v0  ;;  %446 = vmatprep.subr.mxu0 %v586_v0  ;;  %v251_v35 = vld [vmem:[#allocation7 + $0xd8] sm:$0xff]  ;;  %v250_v36 = vld [vmem:[#allocation7 + $0xd0] sm:$0xff]  ;;  %v249_v37 = vld [vmem:[#allocation7 + $0xc8] sm:$0xff]  ;;  %p563_p5 = pnand %p562_p4, %p556_p1 }
  0x2f   :  { %416 = vmatpush3.msra.mxu1 %v156_v7  ;;  %447 = vmatpush3.msra.mxu0 %v256_v30  ;;  %v248_v38 = vld [vmem:[#allocation7 + $0xc0] sm:$0xff]  ;;  %v247_v39 = vld [vmem:[#allocation7 + $0xb8] sm:$0xff]  ;;  %v246_v40 = vld [vmem:[#allocation7 + $0xb0] sm:$0xff] }
  0x30   :  { %417 = vmatprep.subr.mxu1 %v586_v0  ;;  %448 = vmatprep.subr.mxu0 %v586_v0  ;;  %v245_v41 = vld [vmem:[#allocation7 + $0xa8] sm:$0xff]  ;;  %v244_v42 = vld [vmem:[#allocation7 + $0xa0] sm:$0xff]  ;;  %v243_v43 = vld [vmem:[#allocation7 + $0x98] sm:$0xff] }
  0x31   :  { %418 = vmatpush3.msra.mxu1 %v155_v8  ;;  %449 = vmatpush3.msra.mxu0 %v255_v31  ;;  %v242_v44 = vld [vmem:[#allocation7 + $0x90] sm:$0xff]  ;;  %v333_v56 = vld [vmem:[#allocation5] sm:$0xff] }
  0x32   :  { %419 = vmatprep.subr.mxu1 %v586_v0  ;;  %450 = vmatprep.subr.mxu0 %v586_v0  ;;  %v362_v45 = vld [vmem:[%s675_s3 + $0x1] ss:$0 sm:$0xff]  ;;  %v364_v54 = vld [vmem:[%s675_s3 + $0x2] ss:$0 sm:$0xff] }
  0x33   :  { %420 = vmatpush3.msra.mxu1 %v154_v9  ;;  %451 = vmatpush3.msra.mxu0 %v254_v32 }
  0x34   :  { %421 = vmatprep.subr.mxu1 %v586_v0  ;;  %452 = vmatprep.subr.mxu0 %v586_v0 }
  0x35   :  { %422 = vmatpush3.msra.mxu1 %v153_v10  ;;  %453 = vmatpush3.msra.mxu0 %v253_v33 }
  0x36   :  { %423 = vmatprep.subr.mxu1 %v586_v0  ;;  %454 = vmatprep.subr.mxu0 %v586_v0 }
  0x37   :  { %424 = vmatpush3.msra.mxu1 %v152_v11  ;;  %455 = vmatpush3.msra.mxu0 %v252_v34 }
  0x38   :  { %425 = vmatprep.subr.mxu1 %v586_v0  ;;  %456 = vmatprep.subr.mxu0 %v586_v0 }
  0x39   :  { %426 = vmatpush3.msra.mxu1 %v151_v12  ;;  %457 = vmatpush3.msra.mxu0 %v251_v35 }
  0x3a   :  { %427 = vmatprep.subr.mxu1 %v586_v0  ;;  %458 = vmatprep.subr.mxu0 %v586_v0 }
  0x3b   :  { %428 = vmatpush3.msra.mxu1 %v150_v13  ;;  %459 = vmatpush3.msra.mxu0 %v250_v36 }
  0x3c   :  { %429 = vmatprep.subr.mxu1 %v586_v0  ;;  %460 = vmatprep.subr.mxu0 %v586_v0 }
  0x3d   :  { %430 = vmatpush3.msra.mxu1 %v149_v14  ;;  %461 = vmatpush3.msra.mxu0 %v249_v37 }
  0x3e   :  { %431 = vmatprep.subr.mxu1 %v586_v0  ;;  %462 = vmatprep.subr.mxu0 %v586_v0 }
  0x3f   :  { %432 = vmatpush3.msra.mxu1 %v148_v15  ;;  %463 = vmatpush3.msra.mxu0 %v248_v38 }
  0x40   :  { %433 = vmatprep.subr.mxu1 %v586_v0  ;;  %464 = vmatprep.subr.mxu0 %v586_v0 }
  0x41   :  { %434 = vmatpush3.msra.mxu1 %v147_v16  ;;  %465 = vmatpush3.msra.mxu0 %v247_v39 }
  0x42   :  { %435 = vmatprep.subr.mxu1 %v586_v0  ;;  %466 = vmatprep.subr.mxu0 %v586_v0 }
  0x43   :  { %436 = vmatpush3.msra.mxu1 %v146_v17  ;;  %467 = vmatpush3.msra.mxu0 %v246_v40 }
  0x44   :  { %437 = vmatprep.subr.mxu1 %v586_v0  ;;  %468 = vmatprep.subr.mxu0 %v586_v0 }
  0x45   :  { %438 = vmatpush3.msra.mxu1 %v145_v18  ;;  %469 = vmatpush3.msra.mxu0 %v245_v41 }
  0x46   :  { %439 = vmatprep.subr.mxu1 %v586_v0  ;;  %470 = vmatprep.subr.mxu0 %v586_v0 }
  0x47   :  { %440 = vmatpush3.msra.mxu1 %v144_v19  ;;  %471 = vmatpush3.msra.mxu0 %v244_v42 }
  0x48   :  { %472 = vmatprep.subr.mxu0 %v586_v0 }
  0x49   :  { %473 = vmatpush3.msra.mxu0 %v243_v43 }
  0x4a   :  { %474 = vmatprep.subr.mxu0 %v586_v0 }
  0x4b   :  { %475 = vmatpush3.msra.mxu0 %v242_v44 }
  0xeb   :  { %v133_v21 = vpop.f32.mrf.mxu0 }
  0xec   :  { %v134_v22 = vadd.f32 %v359_v20, %v133_v21 }
  0xed   :  { %v408_v23 = vpop.f32.mrf.mxu0 }
  0xee   :  { %v361_v24 = vmul.f32 -1.442695, %v134_v22 }
  0xf0   :  { %487 = vpow2.f32 %v361_v24 }
  0xfd   :  { %v488_v25 = vpop.eup %487 }
  0xfe   :  { %v140_v26 = vadd.f32 1.0, %v488_v25 }
 0x100   :  { %489 = vrcp.f32 %v140_v26 }
 0x10d   :  { %v490_v27 = vpop.eup %489 }
 0x10e   :  { %v143_v28 = vmul.f32 %v490_v27, %v134_v22 }
 0x110   :  { %442 = vmatmul.mubr.f32.vlgmr.msra.gmra.mxu1 %v143_v28 }
 0x1d0   :  { %v231_v46 = vpop.f32.mrf.mxu1 }
 0x1d1   :  { %v232_v47 = vadd.f32 %v362_v45, %v231_v46 }
 0x1d2   :  { %v443_v48 = vpop.f32.mrf.mxu1 }
 0x1d3   :  { %v363_v49 = vmul.f32 -1.442695, %v232_v47 }
 0x1d5   :  { %491 = vpow2.f32 %v363_v49 }
 0x1e2   :  { %v492_v50 = vpop.eup %491 }
 0x1e3   :  { %v238_v51 = vadd.f32 1.0, %v492_v50 }
 0x1e5   :  { %493 = vrcp.f32 %v238_v51 }
 0x1f2   :  { %v494_v52 = vpop.eup %493 }
 0x1f3   :  { %v241_v53 = vmul.f32 %v494_v52, %v232_v47 }
 0x1f5   :  { %477 = vmatmul.mubr.f32.vlgmr.msra.gmra.mxu0 %v241_v53 }
 0x2b5   :  { %v329_v55 = vpop.f32.mrf.mxu0 }
 0x2b6   :  { %v330_v57 = vadd.f32 %v364_v54, %v329_v55 }
 0x2b7   :  { %v478_v58 = vpop.f32.mrf.mxu0 }
 0x2b8   :  { %v334_v59 = vsub.f32 %v330_v57, %v333_v56 }
 0x2ba   :  { %v335_v60 = vmul.f32 %v334_v59, %v334_v59 }
 0x2bc   :  { %v336_v61 = vrot.slane %v335_v60, 4 }
 0x2be   :  { %v337_v62 = vadd.f32 %v336_v61, %v335_v60 }
 0x2c0   :  { %v338_v63 = vrot.slane %v337_v62, 2 }
 0x2c2   :  { %v339_v0 = vadd.f32 %v338_v63, %v337_v62 }
 0x2c4   :  { %v340_v1 = vrot.slane %v339_v0, 1 }
 0x2c6   :  { %v341_v2 = vadd.f32 %v340_v1, %v339_v0 }
 0x2c8   :  { %342 = vst [vmem:[#allocation8] sm:$0x1] %v341_v2 }
 0x2c9   :  { %566 = shalt.err (!%p563_p5)
}
 0x2ca   :  { %352 = dma.vmem_to_hbm [thread:$0]  %s350_s10, 16, %s676_s4, [#allocation4]  }
 0x2cb   :  { %579 = dma.done.wait [#allocation4], 16  }
 0x2cc   :  { %580 = vsyncadd [#allocation4], 4294967280 }
 0x2cd   :  { %356 = vsyncpa [#allocation3], 1 }
 0x2ce   :  { %357 = vsyncpa [#allocation6], 1 }
 0x2cf   :  { %358 = vsyncpa [#allocation4], 1 }

</bundles_post_ra>
